<compile_context>
chip_gen: v7x
topology: tpu7x:2x2x1
jax: 0.10.0
libtpu: 0.0.40
codegen_flags: <defaults>
</compile_context>

<pallas_src>
import math
import functools

import jax
import jax.numpy as jnp
import numpy as np
from jax import lax
from jax.experimental import pallas as pl
from jax.experimental.pallas import tpu as pltpu


def _gru_kernel(x_ref, h0_ref, wi_ref, wh_ref, pb_ref, bhn_ref, out_ref, hT_ref):
    """One grid step = tc timesteps of the recurrence for one batch block.

    x_ref:   (tc, bb, D)  time-major input chunk
    h0_ref:  (bb, H)      initial hidden state (f32)
    wi_ref:  (D, 3H)      input weights (transposed), resident
    wh_ref:  (H, 3H)      hidden weights (transposed), resident
    pb_ref:  (bb, 3H)     f32: ctx@Wp^T + bp + bi + [bh_r, bh_i, 0]
    bhn_ref: (1, H)       f32: bh_n  (must stay inside resetgate * (...))
    out_ref: (tc, bb, H)  per-step hidden states (time-major)
    hT_ref:  (bb, H)      f32 VMEM-resident carry / final hidden state
    """
    c = pl.program_id(1)                 # time-chunk index (inner, sequential)
    H = hT_ref.shape[-1]
    tc = x_ref.shape[0]

    @pl.when(c == 0)
    def _init():
        hT_ref[...] = h0_ref[...]

    # Loop-invariant loads hoisted out of the recurrence.
    wi = wi_ref[...]
    wh = wh_ref[...]
    pb = pb_ref[...]
    bhn = bhn_ref[...]
    cdt = wh.dtype

    def _sigmoid(z):
        # One EUP push (tanh) instead of exp + reciprocal on the serial path.
        return 0.5 * jnp.tanh(0.5 * z) + 0.5

    def step(j, h):
        xj = x_ref[j]                                           # (bb, D) full tile
        ig = jnp.dot(xj.astype(cdt), wi,
                     preferred_element_type=jnp.float32) + pb   # (bb, 3H)
        hg = jnp.dot(h.astype(cdt), wh,
                     preferred_element_type=jnp.float32)        # (bb, 3H)
        resetgate = _sigmoid(ig[:, :H] + hg[:, :H])
        inputgate = _sigmoid(ig[:, H:2 * H] + hg[:, H:2 * H])
        newgate = jnp.tanh(ig[:, 2 * H:] + resetgate * (hg[:, 2 * H:] + bhn))
        h = newgate + inputgate * (h - newgate)
        out_ref[j] = h.astype(out_ref.dtype)
        return h

    h = hT_ref[...]                       # f32 carry from the previous chunk
    h = lax.fori_loop(0, tc, step, h, unroll=min(tc, 8))
    hT_ref[...] = h


def _pick_time_chunk(T, bb, D, H, act_bytes, w_bytes, budget_bytes):
    """Largest divisor of T whose double-buffered chunks fit the VMEM budget."""
    resident = (2 * (D + H) * 3 * H * w_bytes      # Wi^T + Wh^T (double-buffered)
                + 2 * bb * 3 * H * 4               # peephole/bias row
                + 2 * bb * H * 4                   # h0 block
                + 2 * bb * H * 4                   # hT carry block
                + 2 * H * 4)                       # bh_n row
    per_t = 2 * bb * (D + H) * act_bytes           # double-buffered x + out chunks
    cap = max(1, (budget_bytes - resident) // per_t)
    tc = 1
    for cand in range(1, T + 1):
        if T % cand == 0 and cand <= cap:
            tc = cand
    return tc


@functools.partial(jax.jit, static_argnames=("tc", "batch_blocks", "compute_dtype",
                                              "vmem_budget_bytes"))
def conditional_gru_forward(x, hidden, ctx, wi, bi, wh, bh, wp, bp, *,
                            tc=None, batch_blocks=None,
                            compute_dtype=jnp.bfloat16,
                            vmem_budget_bytes=32 * 1024 * 1024):
    """Pallas implementation of ConditionalGRU.forward.

    x: (B, T, D), hidden: (B, H), ctx: (B, H) (2-D, as required by chunk(3, 1)).
    wi/bi, wh/bh, wp/bp follow the PyTorch nn.Linear convention ((3H, in), (3H,)).
    compute_dtype: dtype of the matmul operands (bf16 default; accumulate f32).
    Returns: output (B, T, H), final hidden (B, H).
    """
    B, T, D = x.shape
    H = hidden.shape[-1]
    out_dtype = x.dtype

    # ---- hoisted, step-invariant work (off the sequential critical path) ----
    # Peephole projection + every bias NOT gated by the resetgate.  bh_n must
    # stay inside resetgate*(h@Wh_n + bh_n) and is passed separately.
    bh_ri = jnp.concatenate([bh[:2 * H], jnp.zeros((H,), bh.dtype)])
    pb = (jnp.dot(ctx.astype(jnp.float32), wp.T.astype(jnp.float32),
                  precision=jax.lax.Precision.HIGHEST)
          + bp + bi + bh_ri).astype(jnp.float32)               # (B, 3H)
    bhn = bh[2 * H:].astype(jnp.float32).reshape(1, H)         # (1, H)

    wi_t = wi.T.astype(compute_dtype)                          # (D, 3H) resident
    wh_t = wh.T.astype(compute_dtype)                          # (H, 3H) resident
    h0 = hidden.astype(jnp.float32)

    # ---- pad batch to a multiple of 8 so tiles fill sublanes ----
    Bp = ((B + 7) // 8) * 8
    if Bp != B:
        x = jnp.pad(x, ((0, Bp - B), (0, 0), (0, 0)))
        h0 = jnp.pad(h0, ((0, Bp - B), (0, 0)))
        pb = jnp.pad(pb, ((0, Bp - B), (0, 0)))

    # ---- grid geometry ----
    if batch_blocks is None:
        nb = 2 if Bp % 16 == 0 else 1      # v7x: shard batch over 2 TensorCores
    else:
        nb = batch_blocks
    if Bp % nb != 0 or (Bp // nb) % 8 != 0:
        raise ValueError(f"batch_blocks={nb} incompatible with padded batch {Bp}")
    bb = Bp // nb

    act_bytes = jnp.dtype(out_dtype).itemsize
    w_bytes = jnp.dtype(compute_dtype).itemsize
    if tc is None:
        tc = _pick_time_chunk(T, bb, D, H, act_bytes, w_bytes, vmem_budget_bytes)
    if T % tc != 0:
        raise ValueError(f"tc={tc} must divide T={T}")

    x_t = jnp.transpose(x, (1, 0, 2))                          # (T, Bp, D) time-major

    out_t, hT = pl.pallas_call(
        _gru_kernel,
        out_shape=(
            jax.ShapeDtypeStruct((T, Bp, H), out_dtype),       # per-step hidden states
            jax.ShapeDtypeStruct((Bp, H), jnp.float32),        # final hidden (f32 carry)
        ),
        grid_spec=pltpu.PrefetchScalarGridSpec(
            num_scalar_prefetch=0,
            grid=(nb, T // tc),
            in_specs=[
                pl.BlockSpec((tc, bb, D), lambda b, c: (c, b, 0)),     # x chunk
                pl.BlockSpec((bb, H), lambda b, c: (b, 0)),            # h0
                pl.BlockSpec((D, 3 * H), lambda b, c: (0, 0)),         # Wi^T (resident)
                pl.BlockSpec((H, 3 * H), lambda b, c: (0, 0)),         # Wh^T (resident)
                pl.BlockSpec((bb, 3 * H), lambda b, c: (b, 0)),        # peephole + biases
                pl.BlockSpec((1, H), lambda b, c: (0, 0)),             # bh_n
            ],
            out_specs=[
                pl.BlockSpec((tc, bb, H), lambda b, c: (c, b, 0)),     # outputs
                pl.BlockSpec((bb, H), lambda b, c: (b, 0)),            # final h / carry
            ],
        ),
        compiler_params=pltpu.CompilerParams(
            dimension_semantics=("parallel", "arbitrary"),   # batch parallel, time serial
            vmem_limit_bytes=48 * 1024 * 1024,
        ),
    )(x_t, h0, wi_t, wh_t, pb, bhn)

    out = jnp.transpose(out_t, (1, 0, 2))[:B]                  # (B, T, H)
    return out, hT[:B].astype(hidden.dtype)


def _reference_forward(x, hidden, ctx, wi, bi, wh, bh, wp, bp):
    """Pure-JAX reference mirroring the PyTorch module exactly."""
    H = hidden.shape[-1]
    peep_gate = ctx @ wp.T + bp

    def step(h, x_t):
        ig = x_t @ wi.T + bi
        hg = h @ wh.T + bh
        i_r, i_i, i_n = ig[:, :H], ig[:, H:2 * H], ig[:, 2 * H:]
        h_r, h_i, h_n = hg[:, :H], hg[:, H:2 * H], hg[:, 2 * H:]
        p_r, p_i, p_n = peep_gate[:, :H], peep_gate[:, H:2 * H], peep_gate[:, 2 * H:]
        resetgate = jax.nn.sigmoid(i_r + h_r + p_r)
        inputgate = jax.nn.sigmoid(i_i + h_i + p_i)
        newgate = jnp.tanh(i_n + resetgate * h_n + p_n)
        hy = newgate + inputgate * (h - newgate)
        return hy, hy

    hT, ys = lax.scan(step, hidden, jnp.transpose(x, (1, 0, 2)))
    return jnp.transpose(ys, (1, 0, 2)), hT


if __name__ == "__main__":
    # Small shapes consistent with the module's forward.
    B, T, D, H = 2, 16, 16, 32

    key = jax.random.PRNGKey(0)
    keys = jax.random.split(key, 9)

    # Parameter init matching reset_parameters(): U(-stdv, stdv).
    stdv = 1.0 / math.sqrt(H)
    wi = jax.random.uniform(keys[0], (3 * H, D), jnp.float32, -stdv, stdv)
    bi = jax.random.uniform(keys[1], (3 * H,), jnp.float32, -stdv, stdv)
    wh = jax.random.uniform(keys[2], (3 * H, H), jnp.float32, -stdv, stdv)
    bh = jax.random.uniform(keys[3], (3 * H,), jnp.float32, -stdv, stdv)
    wp = jax.random.uniform(keys[4], (3 * H, H), jnp.float32, -stdv, stdv)
    bp = jax.random.uniform(keys[5], (3 * H,), jnp.float32, -stdv, stdv)

    # Example inputs (ctx is 2-D, as the module's chunk(3, 1) math requires).
    x = jax.random.normal(keys[6], (B, T, D), jnp.float32)
    h0 = jax.random.normal(keys[7], (B, H), jnp.float32)
    ctx = jax.random.normal(keys[8], (B, H), jnp.float32)

    with jax.default_matmul_precision("highest"):
        ref_out, ref_hT = _reference_forward(x, h0, ctx, wi, bi, wh, bh, wp, bp)

    # 1) f32 matmul operands, tc=4 -> time grid of 4: exercises the cross-chunk
    #    f32 hidden-state carry.  Tolerance covers MXU default-precision vs.
    #    HIGHEST-precision reference differences.
    out32, hT32 = conditional_gru_forward(x, h0, ctx, wi, bi, wh, bh, wp, bp,
                                          tc=4, compute_dtype=jnp.float32)
    out32 = jax.block_until_ready(out32)
    hT32 = jax.block_until_ready(hT32)
    assert out32.shape == (B, T, H) and hT32.shape == (B, H)
    np.testing.assert_allclose(np.asarray(out32), np.asarray(ref_out),
                               rtol=2e-2, atol=2e-2)
    np.testing.assert_allclose(np.asarray(hT32), np.asarray(ref_hT),
                               rtol=2e-2, atol=2e-2)

    # 2) Default path: bf16 matmul operands, VMEM-budget-chosen time chunk.
    #    Looser tolerance accounts for bf16 weight/activation rounding.
    out16, hT16 = conditional_gru_forward(x, h0, ctx, wi, bi, wh, bh, wp, bp)
    out16 = jax.block_until_ready(out16)
    hT16 = jax.block_until_ready(hT16)
    assert out16.shape == (B, T, H) and hT16.shape == (B, H)
    np.testing.assert_allclose(np.asarray(out16), np.asarray(ref_out),
                               rtol=6e-2, atol=6e-2)
    np.testing.assert_allclose(np.asarray(hT16), np.asarray(ref_hT),
                               rtol=6e-2, atol=6e-2)

    print("KERNEL_OK")
</pallas_src>

<mosaic_0001>
module attributes {stable_mosaic.version = 11 : i64} {
  func.func @_gru_kernel(%arg0: i32, %arg1: i32, %arg2: memref<4x8x16xf32, #tpu.memory_space<vmem>>, %arg3: memref<8x32xf32, #tpu.memory_space<vmem>>, %arg4: memref<16x96xf32, #tpu.memory_space<vmem>>, %arg5: memref<32x96xf32, #tpu.memory_space<vmem>>, %arg6: memref<8x96xf32, #tpu.memory_space<vmem>>, %arg7: memref<1x32xf32, #tpu.memory_space<vmem>>, %arg8: memref<4x8x32xf32, #tpu.memory_space<vmem>>, %arg9: memref<8x32xf32, #tpu.memory_space<vmem>>) attributes {dimension_semantics = [#tpu.dimension_semantics<parallel>, #tpu.dimension_semantics<arbitrary>], iteration_bounds = array<i64: 1, 4>, scalar_prefetch = 0 : i64, scratch_operands = 0 : i64, tpu.core_type = #tpu.core_type<tc>, window_params = [{transform_indices = @transform_0, window_bounds = array<i64: 4, 8, 16>}, {transform_indices = @transform_1, window_bounds = array<i64: 8, 32>}, {pipeline_mode = #tpu.pipeline_mode<synchronous>, transform_indices = @transform_2, window_bounds = array<i64: 16, 96>}, {pipeline_mode = #tpu.pipeline_mode<synchronous>, transform_indices = @transform_3, window_bounds = array<i64: 32, 96>}, {transform_indices = @transform_4, window_bounds = array<i64: 8, 96>}, {pipeline_mode = #tpu.pipeline_mode<synchronous>, transform_indices = @transform_5, window_bounds = array<i64: 1, 32>}, {transform_indices = @transform_6, window_bounds = array<i64: 4, 8, 32>}, {transform_indices = @transform_7, window_bounds = array<i64: 8, 32>}]} {
    %c0_i32 = arith.constant 0 : i32
    %0 = arith.cmpi eq, %arg1, %c0_i32 : i32
    %1 = arith.extui %0 : i1 to i32
    %c0_i32_0 = arith.constant 0 : i32
    %2 = arith.cmpi ne, %1, %c0_i32_0 : i32
    scf.if %2 {
      %c0_60 = arith.constant 0 : index
      %c0_61 = arith.constant 0 : index
      %169 = vector.load %arg3[%c0_60, %c0_61] : memref<8x32xf32, #tpu.memory_space<vmem>>, vector<8x32xf32>
      %c0_62 = arith.constant 0 : index
      %c0_63 = arith.constant 0 : index
      %170 = vector.load %arg9[%c0_62, %c0_63] : memref<8x32xf32, #tpu.memory_space<vmem>>, vector<8x32xf32>
      tpu.vector_store %arg9[%c0_62, %c0_63], %169 {strides = array<i32>} : memref<8x32xf32, #tpu.memory_space<vmem>>, vector<8x32xf32>,
    } else {
    }
    %c0 = arith.constant 0 : index
    %c0_1 = arith.constant 0 : index
    %3 = vector.load %arg4[%c0, %c0_1] : memref<16x96xf32, #tpu.memory_space<vmem>>, vector<16x96xf32>
    %c0_2 = arith.constant 0 : index
    %c0_3 = arith.constant 0 : index
    %4 = vector.load %arg5[%c0_2, %c0_3] : memref<32x96xf32, #tpu.memory_space<vmem>>, vector<32x96xf32>
    %c0_4 = arith.constant 0 : index
    %c0_5 = arith.constant 0 : index
    %5 = vector.load %arg6[%c0_4, %c0_5] : memref<8x96xf32, #tpu.memory_space<vmem>>, vector<8x96xf32>
    %c0_6 = arith.constant 0 : index
    %c0_7 = arith.constant 0 : index
    %6 = vector.load %arg7[%c0_6, %c0_7] : memref<1x32xf32, #tpu.memory_space<vmem>>, vector<1x32xf32>
    %c0_8 = arith.constant 0 : index
    %c0_9 = arith.constant 0 : index
    %7 = vector.load %arg9[%c0_8, %c0_9] : memref<8x32xf32, #tpu.memory_space<vmem>>, vector<8x32xf32>
    %c0_i32_10 = arith.constant 0 : i32
    %8 = arith.index_cast %c0_i32_10 : i32 to index
    %c0_11 = arith.constant 0 : index
    %c0_12 = arith.constant 0 : index
    %9 = vector.load %arg2[%8, %c0_11, %c0_12] : memref<4x8x16xf32, #tpu.memory_space<vmem>>, vector<1x8x16xf32>
    %10 = vector.shape_cast %9 : vector<1x8x16xf32> to vector<8x16xf32>
    %cst = arith.constant dense<0.000000e+00> : vector<8x96xf32>
    %11 = tpu.matmul %10, %3, %cst {dimension_numbers = #tpu.dot_dimension_numbers<[1], [0], [0], [1], [0, 0, 1, 1], [], []>} : vector<8x16xf32>, vector<16x96xf32>, vector<8x96xf32> -> vector<8x96xf32>
    %12 = arith.addf %11, %5 : vector<8x96xf32>
    %cst_13 = arith.constant dense<0.000000e+00> : vector<8x96xf32>
    %13 = tpu.matmul %7, %4, %cst_13 {dimension_numbers = #tpu.dot_dimension_numbers<[1], [0], [0], [1], [0, 0, 1, 1], [], []>} : vector<8x32xf32>, vector<32x96xf32>, vector<8x96xf32> -> vector<8x96xf32>
    %14 = vector.extract_strided_slice %12 {offsets = [0, 0], sizes = [8, 32], strides = [1, 1]} : vector<8x96xf32> to vector<8x32xf32>
    %15 = vector.extract_strided_slice %13 {offsets = [0, 0], sizes = [8, 32], strides = [1, 1]} : vector<8x96xf32> to vector<8x32xf32>
    %16 = arith.addf %14, %15 : vector<8x32xf32>
    %cst_14 = arith.constant 5.000000e-01 : f32
    %17 = vector.broadcast %cst_14 : f32 to vector<8x32xf32>
    %18 = arith.mulf %17, %16 : vector<8x32xf32>
    %19 = math.tanh %18 : vector<8x32xf32>
    %cst_15 = arith.constant 5.000000e-01 : f32
    %20 = vector.broadcast %cst_15 : f32 to vector<8x32xf32>
    %21 = arith.mulf %20, %19 : vector<8x32xf32>
    %cst_16 = arith.constant 5.000000e-01 : f32
    %22 = vector.broadcast %cst_16 : f32 to vector<8x32xf32>
    %23 = arith.addf %21, %22 : vector<8x32xf32>
    %24 = vector.extract_strided_slice %12 {offsets = [0, 32], sizes = [8, 32], strides = [1, 1]} : vector<8x96xf32> to vector<8x32xf32>
    %25 = vector.extract_strided_slice %13 {offsets = [0, 32], sizes = [8, 32], strides = [1, 1]} : vector<8x96xf32> to vector<8x32xf32>
    %26 = arith.addf %24, %25 : vector<8x32xf32>
    %cst_17 = arith.constant 5.000000e-01 : f32
    %27 = vector.broadcast %cst_17 : f32 to vector<8x32xf32>
    %28 = arith.mulf %27, %26 : vector<8x32xf32>
    %29 = math.tanh %28 : vector<8x32xf32>
    %cst_18 = arith.constant 5.000000e-01 : f32
    %30 = vector.broadcast %cst_18 : f32 to vector<8x32xf32>
    %31 = arith.mulf %30, %29 : vector<8x32xf32>
    %cst_19 = arith.constant 5.000000e-01 : f32
    %32 = vector.broadcast %cst_19 : f32 to vector<8x32xf32>
    %33 = arith.addf %31, %32 : vector<8x32xf32>
    %34 = vector.extract_strided_slice %12 {offsets = [0, 64], sizes = [8, 32], strides = [1, 1]} : vector<8x96xf32> to vector<8x32xf32>
    %35 = vector.extract_strided_slice %13 {offsets = [0, 64], sizes = [8, 32], strides = [1, 1]} : vector<8x96xf32> to vector<8x32xf32>
    %36 = vector.broadcast %6 : vector<1x32xf32> to vector<8x32xf32>
    %37 = arith.addf %35, %36 : vector<8x32xf32>
    %38 = arith.mulf %23, %37 : vector<8x32xf32>
    %39 = arith.addf %34, %38 : vector<8x32xf32>
    %40 = math.tanh %39 : vector<8x32xf32>
    %41 = arith.subf %7, %40 : vector<8x32xf32>
    %42 = arith.mulf %33, %41 : vector<8x32xf32>
    %43 = arith.addf %40, %42 : vector<8x32xf32>
    %44 = arith.index_cast %c0_i32_10 : i32 to index
    %c0_20 = arith.constant 0 : index
    %c0_21 = arith.constant 0 : index
    %45 = vector.load %arg8[%44, %c0_20, %c0_21] : memref<4x8x32xf32, #tpu.memory_space<vmem>>, vector<1x8x32xf32>
    %46 = vector.shape_cast %45 : vector<1x8x32xf32> to vector<8x32xf32>
    %47 = vector.shape_cast %43 : vector<8x32xf32> to vector<1x8x32xf32>
    tpu.vector_store %arg8[%44, %c0_20, %c0_21], %47 {strides = array<i32>} : memref<4x8x32xf32, #tpu.memory_space<vmem>>, vector<1x8x32xf32>,
    %c1_i32 = arith.constant 1 : i32
    %48 = arith.index_cast %c1_i32 : i32 to index
    %c0_22 = arith.constant 0 : index
    %c0_23 = arith.constant 0 : index
    %49 = vector.load %arg2[%48, %c0_22, %c0_23] : memref<4x8x16xf32, #tpu.memory_space<vmem>>, vector<1x8x16xf32>
    %50 = vector.shape_cast %49 : vector<1x8x16xf32> to vector<8x16xf32>
    %cst_24 = arith.constant dense<0.000000e+00> : vector<8x96xf32>
    %51 = tpu.matmul %50, %3, %cst_24 {dimension_numbers = #tpu.dot_dimension_numbers<[1], [0], [0], [1], [0, 0, 1, 1], [], []>} : vector<8x16xf32>, vector<16x96xf32>, vector<8x96xf32> -> vector<8x96xf32>
    %52 = arith.addf %51, %5 : vector<8x96xf32>
    %cst_25 = arith.constant dense<0.000000e+00> : vector<8x96xf32>
    %53 = tpu.matmul %43, %4, %cst_25 {dimension_numbers = #tpu.dot_dimension_numbers<[1], [0], [0], [1], [0, 0, 1, 1], [], []>} : vector<8x32xf32>, vector<32x96xf32>, vector<8x96xf32> -> vector<8x96xf32>
    %54 = vector.extract_strided_slice %52 {offsets = [0, 0], sizes = [8, 32], strides = [1, 1]} : vector<8x96xf32> to vector<8x32xf32>
    %55 = vector.extract_strided_slice %53 {offsets = [0, 0], sizes = [8, 32], strides = [1, 1]} : vector<8x96xf32> to vector<8x32xf32>
    %56 = arith.addf %54, %55 : vector<8x32xf32>
    %cst_26 = arith.constant 5.000000e-01 : f32
    %57 = vector.broadcast %cst_26 : f32 to vector<8x32xf32>
    %58 = arith.mulf %57, %56 : vector<8x32xf32>
    %59 = math.tanh %58 : vector<8x32xf32>
    %cst_27 = arith.constant 5.000000e-01 : f32
    %60 = vector.broadcast %cst_27 : f32 to vector<8x32xf32>
    %61 = arith.mulf %60, %59 : vector<8x32xf32>
    %cst_28 = arith.constant 5.000000e-01 : f32
    %62 = vector.broadcast %cst_28 : f32 to vector<8x32xf32>
    %63 = arith.addf %61, %62 : vector<8x32xf32>
    %64 = vector.extract_strided_slice %52 {offsets = [0, 32], sizes = [8, 32], strides = [1, 1]} : vector<8x96xf32> to vector<8x32xf32>
    %65 = vector.extract_strided_slice %53 {offsets = [0, 32], sizes = [8, 32], strides = [1, 1]} : vector<8x96xf32> to vector<8x32xf32>
    %66 = arith.addf %64, %65 : vector<8x32xf32>
    %cst_29 = arith.constant 5.000000e-01 : f32
    %67 = vector.broadcast %cst_29 : f32 to vector<8x32xf32>
    %68 = arith.mulf %67, %66 : vector<8x32xf32>
    %69 = math.tanh %68 : vector<8x32xf32>
    %cst_30 = arith.constant 5.000000e-01 : f32
    %70 = vector.broadcast %cst_30 : f32 to vector<8x32xf32>
    %71 = arith.mulf %70, %69 : vector<8x32xf32>
    %cst_31 = arith.constant 5.000000e-01 : f32
    %72 = vector.broadcast %cst_31 : f32 to vector<8x32xf32>
    %73 = arith.addf %71, %72 : vector<8x32xf32>
    %74 = vector.extract_strided_slice %52 {offsets = [0, 64], sizes = [8, 32], strides = [1, 1]} : vector<8x96xf32> to vector<8x32xf32>
    %75 = vector.extract_strided_slice %53 {offsets = [0, 64], sizes = [8, 32], strides = [1, 1]} : vector<8x96xf32> to vector<8x32xf32>
    %76 = vector.broadcast %6 : vector<1x32xf32> to vector<8x32xf32>
    %77 = arith.addf %75, %76 : vector<8x32xf32>
    %78 = arith.mulf %63, %77 : vector<8x32xf32>
    %79 = arith.addf %74, %78 : vector<8x32xf32>
    %80 = math.tanh %79 : vector<8x32xf32>
    %81 = arith.subf %43, %80 : vector<8x32xf32>
    %82 = arith.mulf %73, %81 : vector<8x32xf32>
    %83 = arith.addf %80, %82 : vector<8x32xf32>
    %84 = arith.index_cast %c1_i32 : i32 to index
    %c0_32 = arith.constant 0 : index
    %c0_33 = arith.constant 0 : index
    %85 = vector.load %arg8[%84, %c0_32, %c0_33] : memref<4x8x32xf32, #tpu.memory_space<vmem>>, vector<1x8x32xf32>
    %86 = vector.shape_cast %85 : vector<1x8x32xf32> to vector<8x32xf32>
    %87 = vector.shape_cast %83 : vector<8x32xf32> to vector<1x8x32xf32>
    tpu.vector_store %arg8[%84, %c0_32, %c0_33], %87 {strides = array<i32>} : memref<4x8x32xf32, #tpu.memory_space<vmem>>, vector<1x8x32xf32>,
    %c2_i32 = arith.constant 2 : i32
    %88 = arith.index_cast %c2_i32 : i32 to index
    %c0_34 = arith.constant 0 : index
    %c0_35 = arith.constant 0 : index
    %89 = vector.load %arg2[%88, %c0_34, %c0_35] : memref<4x8x16xf32, #tpu.memory_space<vmem>>, vector<1x8x16xf32>
    %90 = vector.shape_cast %89 : vector<1x8x16xf32> to vector<8x16xf32>
    %cst_36 = arith.constant dense<0.000000e+00> : vector<8x96xf32>
    %91 = tpu.matmul %90, %3, %cst_36 {dimension_numbers = #tpu.dot_dimension_numbers<[1], [0], [0], [1], [0, 0, 1, 1], [], []>} : vector<8x16xf32>, vector<16x96xf32>, vector<8x96xf32> -> vector<8x96xf32>
    %92 = arith.addf %91, %5 : vector<8x96xf32>
    %cst_37 = arith.constant dense<0.000000e+00> : vector<8x96xf32>
    %93 = tpu.matmul %83, %4, %cst_37 {dimension_numbers = #tpu.dot_dimension_numbers<[1], [0], [0], [1], [0, 0, 1, 1], [], []>} : vector<8x32xf32>, vector<32x96xf32>, vector<8x96xf32> -> vector<8x96xf32>
    %94 = vector.extract_strided_slice %92 {offsets = [0, 0], sizes = [8, 32], strides = [1, 1]} : vector<8x96xf32> to vector<8x32xf32>
    %95 = vector.extract_strided_slice %93 {offsets = [0, 0], sizes = [8, 32], strides = [1, 1]} : vector<8x96xf32> to vector<8x32xf32>
    %96 = arith.addf %94, %95 : vector<8x32xf32>
    %cst_38 = arith.constant 5.000000e-01 : f32
    %97 = vector.broadcast %cst_38 : f32 to vector<8x32xf32>
    %98 = arith.mulf %97, %96 : vector<8x32xf32>
    %99 = math.tanh %98 : vector<8x32xf32>
    %cst_39 = arith.constant 5.000000e-01 : f32
    %100 = vector.broadcast %cst_39 : f32 to vector<8x32xf32>
    %101 = arith.mulf %100, %99 : vector<8x32xf32>
    %cst_40 = arith.constant 5.000000e-01 : f32
    %102 = vector.broadcast %cst_40 : f32 to vector<8x32xf32>
    %103 = arith.addf %101, %102 : vector<8x32xf32>
    %104 = vector.extract_strided_slice %92 {offsets = [0, 32], sizes = [8, 32], strides = [1, 1]} : vector<8x96xf32> to vector<8x32xf32>
    %105 = vector.extract_strided_slice %93 {offsets = [0, 32], sizes = [8, 32], strides = [1, 1]} : vector<8x96xf32> to vector<8x32xf32>
    %106 = arith.addf %104, %105 : vector<8x32xf32>
    %cst_41 = arith.constant 5.000000e-01 : f32
    %107 = vector.broadcast %cst_41 : f32 to vector<8x32xf32>
    %108 = arith.mulf %107, %106 : vector<8x32xf32>
    %109 = math.tanh %108 : vector<8x32xf32>
    %cst_42 = arith.constant 5.000000e-01 : f32
    %110 = vector.broadcast %cst_42 : f32 to vector<8x32xf32>
    %111 = arith.mulf %110, %109 : vector<8x32xf32>
    %cst_43 = arith.constant 5.000000e-01 : f32
    %112 = vector.broadcast %cst_43 : f32 to vector<8x32xf32>
    %113 = arith.addf %111, %112 : vector<8x32xf32>
    %114 = vector.extract_strided_slice %92 {offsets = [0, 64], sizes = [8, 32], strides = [1, 1]} : vector<8x96xf32> to vector<8x32xf32>
    %115 = vector.extract_strided_slice %93 {offsets = [0, 64], sizes = [8, 32], strides = [1, 1]} : vector<8x96xf32> to vector<8x32xf32>
    %116 = vector.broadcast %6 : vector<1x32xf32> to vector<8x32xf32>
    %117 = arith.addf %115, %116 : vector<8x32xf32>
    %118 = arith.mulf %103, %117 : vector<8x32xf32>
    %119 = arith.addf %114, %118 : vector<8x32xf32>
    %120 = math.tanh %119 : vector<8x32xf32>
    %121 = arith.subf %83, %120 : vector<8x32xf32>
    %122 = arith.mulf %113, %121 : vector<8x32xf32>
    %123 = arith.addf %120, %122 : vector<8x32xf32>
    %124 = arith.index_cast %c2_i32 : i32 to index
    %c0_44 = arith.constant 0 : index
    %c0_45 = arith.constant 0 : index
    %125 = vector.load %arg8[%124, %c0_44, %c0_45] : memref<4x8x32xf32, #tpu.memory_space<vmem>>, vector<1x8x32xf32>
    %126 = vector.shape_cast %125 : vector<1x8x32xf32> to vector<8x32xf32>
    %127 = vector.shape_cast %123 : vector<8x32xf32> to vector<1x8x32xf32>
    tpu.vector_store %arg8[%124, %c0_44, %c0_45], %127 {strides = array<i32>} : memref<4x8x32xf32, #tpu.memory_space<vmem>>, vector<1x8x32xf32>,
    %c3_i32 = arith.constant 3 : i32
    %128 = arith.index_cast %c3_i32 : i32 to index
    %c0_46 = arith.constant 0 : index
    %c0_47 = arith.constant 0 : index
    %129 = vector.load %arg2[%128, %c0_46, %c0_47] : memref<4x8x16xf32, #tpu.memory_space<vmem>>, vector<1x8x16xf32>
    %130 = vector.shape_cast %129 : vector<1x8x16xf32> to vector<8x16xf32>
    %cst_48 = arith.constant dense<0.000000e+00> : vector<8x96xf32>
    %131 = tpu.matmul %130, %3, %cst_48 {dimension_numbers = #tpu.dot_dimension_numbers<[1], [0], [0], [1], [0, 0, 1, 1], [], []>} : vector<8x16xf32>, vector<16x96xf32>, vector<8x96xf32> -> vector<8x96xf32>
    %132 = arith.addf %131, %5 : vector<8x96xf32>
    %cst_49 = arith.constant dense<0.000000e+00> : vector<8x96xf32>
    %133 = tpu.matmul %123, %4, %cst_49 {dimension_numbers = #tpu.dot_dimension_numbers<[1], [0], [0], [1], [0, 0, 1, 1], [], []>} : vector<8x32xf32>, vector<32x96xf32>, vector<8x96xf32> -> vector<8x96xf32>
    %134 = vector.extract_strided_slice %132 {offsets = [0, 0], sizes = [8, 32], strides = [1, 1]} : vector<8x96xf32> to vector<8x32xf32>
    %135 = vector.extract_strided_slice %133 {offsets = [0, 0], sizes = [8, 32], strides = [1, 1]} : vector<8x96xf32> to vector<8x32xf32>
    %136 = arith.addf %134, %135 : vector<8x32xf32>
    %cst_50 = arith.constant 5.000000e-01 : f32
    %137 = vector.broadcast %cst_50 : f32 to vector<8x32xf32>
    %138 = arith.mulf %137, %136 : vector<8x32xf32>
    %139 = math.tanh %138 : vector<8x32xf32>
    %cst_51 = arith.constant 5.000000e-01 : f32
    %140 = vector.broadcast %cst_51 : f32 to vector<8x32xf32>
    %141 = arith.mulf %140, %139 : vector<8x32xf32>
    %cst_52 = arith.constant 5.000000e-01 : f32
    %142 = vector.broadcast %cst_52 : f32 to vector<8x32xf32>
    %143 = arith.addf %141, %142 : vector<8x32xf32>
    %144 = vector.extract_strided_slice %132 {offsets = [0, 32], sizes = [8, 32], strides = [1, 1]} : vector<8x96xf32> to vector<8x32xf32>
    %145 = vector.extract_strided_slice %133 {offsets = [0, 32], sizes = [8, 32], strides = [1, 1]} : vector<8x96xf32> to vector<8x32xf32>
    %146 = arith.addf %144, %145 : vector<8x32xf32>
    %cst_53 = arith.constant 5.000000e-01 : f32
    %147 = vector.broadcast %cst_53 : f32 to vector<8x32xf32>
    %148 = arith.mulf %147, %146 : vector<8x32xf32>
    %149 = math.tanh %148 : vector<8x32xf32>
    %cst_54 = arith.constant 5.000000e-01 : f32
    %150 = vector.broadcast %cst_54 : f32 to vector<8x32xf32>
    %151 = arith.mulf %150, %149 : vector<8x32xf32>
    %cst_55 = arith.constant 5.000000e-01 : f32
    %152 = vector.broadcast %cst_55 : f32 to vector<8x32xf32>
    %153 = arith.addf %151, %152 : vector<8x32xf32>
    %154 = vector.extract_strided_slice %132 {offsets = [0, 64], sizes = [8, 32], strides = [1, 1]} : vector<8x96xf32> to vector<8x32xf32>
    %155 = vector.extract_strided_slice %133 {offsets = [0, 64], sizes = [8, 32], strides = [1, 1]} : vector<8x96xf32> to vector<8x32xf32>
    %156 = vector.broadcast %6 : vector<1x32xf32> to vector<8x32xf32>
    %157 = arith.addf %155, %156 : vector<8x32xf32>
    %158 = arith.mulf %143, %157 : vector<8x32xf32>
    %159 = arith.addf %154, %158 : vector<8x32xf32>
    %160 = math.tanh %159 : vector<8x32xf32>
    %161 = arith.subf %123, %160 : vector<8x32xf32>
    %162 = arith.mulf %153, %161 : vector<8x32xf32>
    %163 = arith.addf %160, %162 : vector<8x32xf32>
    %164 = arith.index_cast %c3_i32 : i32 to index
    %c0_56 = arith.constant 0 : index
    %c0_57 = arith.constant 0 : index
    %165 = vector.load %arg8[%164, %c0_56, %c0_57] : memref<4x8x32xf32, #tpu.memory_space<vmem>>, vector<1x8x32xf32>
    %166 = vector.shape_cast %165 : vector<1x8x32xf32> to vector<8x32xf32>
    %167 = vector.shape_cast %163 : vector<8x32xf32> to vector<1x8x32xf32>
    tpu.vector_store %arg8[%164, %c0_56, %c0_57], %167 {strides = array<i32>} : memref<4x8x32xf32, #tpu.memory_space<vmem>>, vector<1x8x32xf32>,
    %c4_i32 = arith.constant 4 : i32
    %c0_58 = arith.constant 0 : index
    %c0_59 = arith.constant 0 : index
    %168 = vector.load %arg9[%c0_58, %c0_59] : memref<8x32xf32, #tpu.memory_space<vmem>>, vector<8x32xf32>
    tpu.vector_store %arg9[%c0_58, %c0_59], %163 {strides = array<i32>} : memref<8x32xf32, #tpu.memory_space<vmem>>, vector<8x32xf32>,
    return
  }
  func.func @transform_0(%arg0: i32, %arg1: i32) -> (i32, i32, i32) {
    %c0_i32 = arith.constant 0 : i32
    %c0_i32_0 = arith.constant 0 : i32
    return %arg1, %arg0, %c0_i32 : i32, i32, i32
  }
  func.func @transform_1(%arg0: i32, %arg1: i32) -> (i32, i32) {
    %c0_i32 = arith.constant 0 : i32
    %c0_i32_0 = arith.constant 0 : i32
    return %arg0, %c0_i32 : i32, i32
  }
  func.func @transform_2(%arg0: i32, %arg1: i32) -> (i32, i32) {
    %c0_i32 = arith.constant 0 : i32
    %c0_i32_0 = arith.constant 0 : i32
    %c0_i32_1 = arith.constant 0 : i32
    return %c0_i32, %c0_i32_0 : i32, i32
  }
  func.func @transform_3(%arg0: i32, %arg1: i32) -> (i32, i32) {
    %c0_i32 = arith.constant 0 : i32
    %c0_i32_0 = arith.constant 0 : i32
    %c0_i32_1 = arith.constant 0 : i32
    return %c0_i32, %c0_i32_0 : i32, i32
  }
  func.func @transform_4(%arg0: i32, %arg1: i32) -> (i32, i32) {
    %c0_i32 = arith.constant 0 : i32
    %c0_i32_0 = arith.constant 0 : i32
    return %arg0, %c0_i32 : i32, i32
  }
  func.func @transform_5(%arg0: i32, %arg1: i32) -> (i32, i32) {
    %c0_i32 = arith.constant 0 : i32
    %c0_i32_0 = arith.constant 0 : i32
    %c0_i32_1 = arith.constant 0 : i32
    return %c0_i32, %c0_i32_0 : i32, i32
  }
  func.func @transform_6(%arg0: i32, %arg1: i32) -> (i32, i32, i32) {
    %c0_i32 = arith.constant 0 : i32
    %c0_i32_0 = arith.constant 0 : i32
    return %arg1, %arg0, %c0_i32 : i32, i32, i32
  }
  func.func @transform_7(%arg0: i32, %arg1: i32) -> (i32, i32) {
    %c0_i32 = arith.constant 0 : i32
    %c0_i32_0 = arith.constant 0 : i32
    return %arg0, %c0_i32 : i32, i32
  }
}

</mosaic_0001>

<bundles_post_ra>
// kernel: conditional_gru_forward.1
= control target key start
LH: loop header
LB: loop body
LE: loop exit
PB: predicated region body
PF: predicated region fallthrough
CT: control target
= control target key end

     0   :  { %s1534_s24 = smov 0   ;;  %s1536_s25 = smov 0   ;;  %s1708_s0 = inlined_call_operand.vmem [shape: f32[16,8,16], index: 0, kind: input, shape index: {}]   ;;  %s1709_s1 = inlined_call_operand.vmem [shape: f32[8,32], index: 1, kind: input, shape index: {}]   ;;  %s1710_s2 = inlined_call_operand.vmem [shape: f32[16,96], index: 2, kind: input, shape index: {}]   ;;  %s1711_s3 = inlined_call_operand.vmem [shape: f32[32,96], index: 3, kind: input, shape index: {}]   ;;  %s1712_s4 = inlined_call_operand.vmem [shape: f32[8,96], index: 4, kind: input, shape index: {}]   ;;  %s1713_s5 = inlined_call_operand.vmem [shape: f32[1,32], index: 5, kind: input, shape index: {}]   ;;  %s1714_s6 = inlined_call_operand.vmem [shape: f32[16,8,32], index: 6, kind: output, shape index: {0}]   ;;  %s1715_s7 = inlined_call_operand.vmem [shape: f32[8,32], index: 7, kind: output, shape index: {1}]  }
   0x1   :  { %s1538_s26 = smov 0  }
   0x2 LB: > { %s27_s27 = sadd.s32 1, %s1482_s25  ;;  %p1254_p0 = scmp.ge.s32.totalorder %s1486_s26, 1  ;;  %s1486_s26 = sphi %s1538_s26, %s18_s26   ;;  %s1482_s25 = sphi %s1536_s25, %s1717_s25   ;;  %s1478_s24 = sphi %s1534_s24, %s1716_s24  }
   0x3   : > { %p28_p1 = scmp.ge.s32.totalorder %s27_s27, 4  ;;  %p278_p2 = scmp.lt.s32.totalorder %s1486_s26, 5 }
   0x5   : > { %s1719_s27 = smov (%p28_p1, %s27_s27), 0  ;;  %p279_p3 = pnand %p1254_p0, %p278_p2 }
   0x6   : > { %s1255_s28 = sshll.u32 (!%p279_p3), %s1478_s24, 2  ;;  %p1259_p5 = scmp.ne.s32.totalorder (!%p279_p3), %s1478_s24, 0 }
   0x7   : > { %282 = sbr.rel (%p279_p3) target bundleno = 3391 (0xd3f), region = 44  ;;  %p329_p4 = scmp.lt.s32.totalorder (!%p279_p3), %s1255_s28, 15 }
   0xe   : > { %s1721_s28 = smov (!%p329_p4, %s1255_s28), 15  ;;  %361 = sbr.rel (%p1259_p5) target bundleno = 21 (0x15), region = 48 }
   0xf   : > { %s1256_s29 = sshll.u32 %s1721_s28, 3  ;;  %v362_v0 = vld [vmem:[%s1709_s1] sm:$0xff] (!%p1259_p5)  ;;  %vm363_vm0 = vcmask (!%p1259_p5), 261120  }
  0x10   : > { %s1555_s9 = scalar_lea.vmem %s1708_s0, %s1256_s29  ;;  %s1560_s12 = scalar_lea.vmem %s1714_s6, %s1256_s29  ;;  %364 = vst.msk [vmem:[%s1715_s7] sm:$0xff] (!%p1259_p5), %vm363_vm0, %v362_v0 }
  0x15 PF: > { %v365_v1 = vld [vmem:[%s1710_s2] sm:$0xff]  ;;  %v366_v2 = vld [vmem:[%s1710_s2 + $0x8] sm:$0xff]  ;;  %v1488_v3 = vmov 0.0|0.0   ;;  %vm1489_vm1 = vmmov 0   ;;  %v1490_v5 = vmov 0.0   ;;  %vm375_vm2 = vcmask 130048  }
  0x16   : > { %1382 = vmatprep.subr.bf16.mxu1 %v1488_v3  ;;  %v1575_v4 = vpack.c.bf16 %v366_v2, %v365_v1  ;;  %1314 = vmatprep.mubr.msk.f32.mxu1 %vm1489_vm1, %v1490_v5  ;;  %v367_v6 = vld [vmem:[%s1711_s3] sm:$0xff]  ;;  %v368_v7 = vld [vmem:[%s1711_s3 + $0x8] sm:$0xff]  ;;  %s1491_s30 = smov 64   ;;  %v369_v11 = vld [vmem:[%s1711_s3 + $0x10] sm:$0xff]  ;;  %vm449_vm3 = vcmask 261120   ;;  %s1492_s18 = smov 32  }
  0x17   : > { %v1262_v8 = vld [vmem:[%s1713_s5] ss:$0 sm:$0xff]  ;;  %1391 = vmatprep.subr.bf16.mxu0 %v1488_v3  ;;  %1332 = vmatprep.mubr.msk.f32.mxu0 %vm1489_vm1, %v1490_v5  ;;  %v1593_v10 = vpack.c.bf16 %v368_v7, %v367_v6  ;;  %v370_v12 = vld [vmem:[%s1711_s3 + $0x18] sm:$0xff]  ;;  %v1263_v35 = vld [vmem:[%s1555_s9 + $0x8] sm:$0xff]  ;;  %s1493_s19 = smov 96  }
  0x18   : > { %1384 = vmatpush3.bf16.msra.mxu1 %v1575_v4  ;;  %v374_v9 = vld [vmem:[%s1555_s9] sm:$0xff]  ;;  %533 = vrot.lane.b32.xlu0 %v1262_v8, %s1491_s30  ;;  %v1607_v13 = vpack.c.bf16 %v370_v12, %v369_v11  ;;  %v1267_v58 = vld [vmem:[%s1555_s9 + $0x10] sm:$0xff] }
  0x19   : > { %1385 = vmatprep.subr.bf16.mxu1 %v1488_v3  ;;  %1393 = vmatpush3.bf16.msra.mxu0 %v1575_v4  ;;  %v373_v14 = vld [vmem:[%s1715_s7] sm:$0xff] }
  0x1a   : > { %1394 = vmatprep.subr.bf16.mxu0 %v1488_v3  ;;  %v1629_v21 = vld [vmem:[%s1712_s4] sm:$0xff] }
  0x1b   : > { %1315 = vmatmul.mubr.msk.f32.vlgmr.msra.gmra.mrb[0].mxu1 %vm375_vm2, %v374_v9 }
  0x1c   : > { %1387 = vmatpush3.bf16.msra.mxu1 %v1593_v10  ;;  %1325 = vmatprep.mubr.msk.f32.mxu1 %vm1489_vm1, %v1490_v5 }
  0x1d   : > { %1388 = vmatprep.subr.bf16.mxu1 %v1488_v3  ;;  %1333 = vmatmul.mubr.msk.f32.vlgmr.msra.gmra.mrb[0].mxu0 %vm375_vm2, %v1263_v35 }
  0x1e   : > { %1396 = vmatpush3.bf16.msra.mxu0 %v1593_v10  ;;  %1343 = vmatprep.mubr.msk.f32.mxu0 %vm1489_vm1, %v1490_v5 }
  0x1f   : > { %1397 = vmatprep.subr.bf16.mxu0 %v1488_v3 }
  0x20   : > { %1390 = vmatpush3.bf16.msra.mxu1 %v1607_v13 }
  0x21   : > { %1400 = vmatprep.subr.bf16.mxu1 %v1488_v3 }
  0x22   : > { %1399 = vmatpush3.bf16.msra.mxu0 %v1607_v13 }
  0x23   : > { %1326 = vmatmul.mubr.msk.f32.vlgmr.msra.gmra.mrb[2].mxu1 %vm449_vm3, %v373_v14  ;;  %1409 = vmatprep.subr.bf16.mxu0 %v1488_v3 }
  0x24   : > { %1402 = vmatpush3.bf16.msra.mxu1 %v1575_v4  ;;  %1350 = vmatprep.mubr.msk.f32.mxu1 %vm1489_vm1, %v1490_v5 }
  0x25   : > { %1403 = vmatprep.subr.bf16.mxu1 %v1488_v3 }
  0x27   : > { %1351 = vmatmul.mubr.msk.f32.vlgmr.msra.gmra.mrb[4].mxu1 %vm375_vm2, %v1267_v58 }
  0x28   : > { %1405 = vmatpush3.bf16.msra.mxu1 %v1593_v10  ;;  %1361 = vmatprep.mubr.msk.f32.mxu1 %vm1489_vm1, %v1490_v5 }
  0x29   : > { %1406 = vmatprep.subr.bf16.mxu1 %v1488_v3 }
  0x2c   : > { %1408 = vmatpush3.bf16.msra.mxu1 %v1607_v13 }
  0x8a   : > { %v1622_v17 = vpop.permute.xlu0 %533 }
  0xee   : > { %v445_v15 = vpop.f32.mrb[0].mxu1 }
  0xef   : > { %v1316_v16 = vpop.f32.mrb[1].mxu1  ;;  %v446_v22 = vadd.f32 %v445_v15, %v1629_v21 }
  0xf0   : > { %v639_v40 = vpop.f32.mrb[0].mxu0 }
  0xf1   : > { %v1334_v41 = vpop.f32.mrb[1].mxu0  ;;  %v640_v46 = vadd.f32 %v639_v40, %v1629_v21 }
  0xf6   : > { %v519_v18 = vpop.f32.mrb[2].mxu1 }
  0xf7   : > { %v536_v19 = vadd.f32 %v1622_v17, %v519_v18  ;;  %v1327_v20 = vpop.f32.mrb[3].mxu1  ;;  %v523_v23 = vadd.f32 %v519_v18, %v446_v22 }
  0xf9   : > { %538 = vrot.lane.b32.xlu0 %v536_v19, %s1491_s30  ;;  %v524_v24 = vmul.f32 0.5, %v523_v23  ;;  %v1271_v23 = vld [vmem:[%s1555_s9 + $0x18] sm:$0xff] }
  0xfa   : > { %v820_v63 = vpop.f32.mrb[4].mxu1 }
  0xfb   : > { %1448 = vtanh.f32 %v524_v24  ;;  %v1352_v0 = vpop.f32.mrb[5].mxu1  ;;  %v821_v7 = vadd.f32 %v820_v63, %v1629_v21 }
 0x105   : > { %v1449_v25 = vpop.eup %1448 }
 0x106   : > { %v526_v26 = vmul.f32 0.5, %v1449_v25 }
 0x108   : > { %v527_v27 = vadd.f32 0.5, %v526_v26 }
 0x16b   : > { %v539_v28 = vpop.permute.xlu0 %538 }
 0x16c   : > { %v541_v29 = vmul.f32 %v539_v28, %v527_v27 }
 0x16e   : > { %543 = vrot.lane.b32.xlu1 %v541_v29, %s1491_s30 }
 0x1e0   : > { %v544_v30 = vpop.permute.xlu1 %543 }
 0x1e1   : > { %v546_v31 = vadd.f32 %v544_v30, %v446_v22 }
 0x1e3   : > { %1450 = vtanh.f32 %v546_v31 }
 0x1ed   : > { %v1451_v32 = vpop.eup %1450 }
 0x1ee   : > { %549 = vrot.lane.b32.xlu1 %v1451_v32, %s1491_s30 }
 0x260   : > { %v550_v33 = vpop.permute.xlu1 %549 }
 0x261   : > { %v552_v34 = vsub.f32 %v373_v14, %v550_v33 }
 0x263   : > { %554 = vrot.lane.b32.xlu0 %v552_v34, %s1492_s18 }
 0x2d5   : > { %v555_v36 = vpop.permute.xlu0 %554 }
 0x2d6   : > { %v557_v37 = vmul.f32 %v555_v36, %v527_v27 }
 0x2d8   : > { %559 = vrot.lane.b32.xlu1 %v557_v37, %s1492_s18 }
 0x34a   : > { %v560_v38 = vpop.permute.xlu1 %559 }
 0x34b   : > { %v562_v39 = vadd.f32 %v1451_v32, %v560_v38 }
 0x34d   : > { %564 = vrot.lane.b32.xlu0 %v562_v39, %s1491_s30 }
 0x3bf   : > { %v565_v42 = vpop.permute.xlu0 %564 }
 0x3c0   : > { %567 = vst.msk [vmem:[%s1560_s12] sm:$0xff] %vm449_vm3, %v565_v42  ;;  %1344 = vmatmul.mubr.msk.f32.vlgmr.msra.gmra.mrb[2].mxu0 %vm449_vm3, %v565_v42 }
 0x3c1   : > { %1411 = vmatpush3.bf16.msra.mxu0 %v1575_v4  ;;  %1368 = vmatprep.mubr.msk.f32.mxu0 %vm1489_vm1, %v1490_v5 }
 0x3c2   : > { %1412 = vmatprep.subr.bf16.mxu0 %v1488_v3 }
 0x3c4   : > { %1369 = vmatmul.mubr.msk.f32.vlgmr.msra.gmra.mrb[4].mxu0 %vm375_vm2, %v1271_v23 }
 0x3c5   : > { %1414 = vmatpush3.bf16.msra.mxu0 %v1593_v10  ;;  %1379 = vmatprep.mubr.msk.f32.mxu0 %vm1489_vm1, %v1490_v5 }
 0x3c6   : > { %1415 = vmatprep.subr.bf16.mxu0 %v1488_v3 }
 0x3c9   : > { %1417 = vmatpush3.bf16.msra.mxu0 %v1607_v13 }
 0x493   : > { %v711_v43 = vpop.f32.mrb[2].mxu0 }
 0x494   : > { %v720_v44 = vadd.f32 %v711_v43, %v1622_v17  ;;  %v1345_v45 = vpop.f32.mrb[3].mxu0  ;;  %v715_v47 = vadd.f32 %v711_v43, %v640_v46 }
 0x496   : > { %722 = vrot.lane.b32.xlu1 %v720_v44, %s1491_s30  ;;  %v716_v48 = vmul.f32 0.5, %v715_v47 }
 0x497   : > { %v1001_v28 = vpop.f32.mrb[4].mxu0 }
 0x498   : > { %1452 = vtanh.f32 %v716_v48  ;;  %v1370_v29 = vpop.f32.mrb[5].mxu0  ;;  %v1002_v13 = vadd.f32 %v1001_v28, %v1629_v21 }
 0x4a2   : > { %v1453_v49 = vpop.eup %1452 }
 0x4a3   : > { %v718_v50 = vmul.f32 0.5, %v1453_v49 }
 0x4a5   : > { %v719_v51 = vadd.f32 0.5, %v718_v50 }
 0x508   : > { %v723_v52 = vpop.permute.xlu1 %722 }
 0x509   : > { %v725_v53 = vmul.f32 %v723_v52, %v719_v51 }
 0x50b   : > { %727 = vrot.lane.b32.xlu0 %v725_v53, %s1491_s30 }
 0x57d   : > { %v728_v54 = vpop.permute.xlu0 %727 }
 0x57e   : > { %v730_v55 = vadd.f32 %v728_v54, %v640_v46 }
 0x580   : > { %1454 = vtanh.f32 %v730_v55 }
 0x58a   : > { %v1455_v56 = vpop.eup %1454 }
 0x58b   : > { %v732_v57 = vsub.f32 %v562_v39, %v1455_v56 }
 0x58d   : > { %734 = vrot.lane.b32.xlu1 %v732_v57, %s1493_s19 }
 0x5ff   : > { %v735_v59 = vpop.permute.xlu1 %734 }
 0x600   : > { %v737_v60 = vmul.f32 %v735_v59, %v719_v51 }
 0x602   : > { %739 = vrot.lane.b32.xlu0 %v737_v60, %s1492_s18 }
 0x674   : > { %v740_v61 = vpop.permute.xlu0 %739 }
 0x675   : > { %v742_v62 = vadd.f32 %v1455_v56, %v740_v61 }
 0x677   : > { %744 = vrot.lane.b32.xlu1 %v742_v62, %s1491_s30 }
 0x6e9   : > { %v745_v1 = vpop.permute.xlu1 %744 }
 0x6ea   : > { %1266 = vst.msk [vmem:[%s1560_s12 + $0x8] sm:$0xff] %vm449_vm3, %v745_v1  ;;  %1362 = vmatmul.mubr.msk.f32.vlgmr.msra.gmra.mrb[6].mxu1 %vm449_vm3, %v745_v1 }
 0x7bd   : > { %v892_v2 = vpop.f32.mrb[6].mxu1 }
 0x7be   : > { %v901_v4 = vadd.f32 %v892_v2, %v1622_v17  ;;  %v1363_v6 = vpop.f32.mrb[7].mxu1  ;;  %v896_v8 = vadd.f32 %v892_v2, %v821_v7 }
 0x7c0   : > { %903 = vrot.lane.b32.xlu0 %v901_v4, %s1491_s30  ;;  %v897_v9 = vmul.f32 0.5, %v896_v8 }
 0x7c2   : > { %1456 = vtanh.f32 %v897_v9 }
 0x7cc   : > { %v1457_v11 = vpop.eup %1456 }
 0x7cd   : > { %v899_v12 = vmul.f32 0.5, %v1457_v11 }
 0x7cf   : > { %v900_v14 = vadd.f32 0.5, %v899_v12 }
 0x832   : > { %v904_v15 = vpop.permute.xlu0 %903 }
 0x833   : > { %v906_v16 = vmul.f32 %v904_v15, %v900_v14 }
 0x835   : > { %908 = vrot.lane.b32.xlu1 %v906_v16, %s1491_s30 }
 0x8a7   : > { %v909_v18 = vpop.permute.xlu1 %908 }
 0x8a8   : > { %v911_v19 = vadd.f32 %v909_v18, %v821_v7 }
 0x8aa   : > { %1458 = vtanh.f32 %v911_v19 }
 0x8b4   : > { %v1459_v20 = vpop.eup %1458 }
 0x8b5   : > { %v913_v22 = vsub.f32 %v742_v62, %v1459_v20 }
 0x8b7   : > { %915 = vrot.lane.b32.xlu0 %v913_v22, %s1493_s19 }
 0x929   : > { %v916_v24 = vpop.permute.xlu0 %915 }
 0x92a   : > { %v918_v25 = vmul.f32 %v916_v24, %v900_v14 }
 0x92c   : > { %920 = vrot.lane.b32.xlu1 %v918_v25, %s1492_s18 }
 0x99e   : > { %v921_v26 = vpop.permute.xlu1 %920 }
 0x99f   : > { %v923_v27 = vadd.f32 %v1459_v20, %v921_v26 }
 0x9a1   : > { %925 = vrot.lane.b32.xlu0 %v923_v27, %s1491_s30 }
 0xa13   : > { %v926_v30 = vpop.permute.xlu0 %925 }
 0xa14   : > { %1270 = vst.msk [vmem:[%s1560_s12 + $0x10] sm:$0xff] %vm449_vm3, %v926_v30  ;;  %1380 = vmatmul.mubr.msk.f32.vlgmr.msra.gmra.mrb[6].mxu0 %vm449_vm3, %v926_v30 }
 0xae7   : > { %v1073_v5 = vpop.f32.mrb[6].mxu0 }
 0xae8   : > { %v1082_v3 = vadd.f32 %v1073_v5, %v1622_v17  ;;  %v1381_v10 = vpop.f32.mrb[7].mxu0  ;;  %v1077_v31 = vadd.f32 %v1073_v5, %v1002_v13 }
 0xaea   : > { %1084 = vrot.lane.b32.xlu1 %v1082_v3, %s1491_s30  ;;  %v1078_v32 = vmul.f32 0.5, %v1077_v31 }
 0xaec   : > { %1460 = vtanh.f32 %v1078_v32 }
 0xaf6   : > { %v1461_v33 = vpop.eup %1460 }
 0xaf7   : > { %v1080_v34 = vmul.f32 0.5, %v1461_v33 }
 0xaf9   : > { %v1081_v35 = vadd.f32 0.5, %v1080_v34 }
 0xb5c   : > { %v1085_v36 = vpop.permute.xlu1 %1084 }
 0xb5d   : > { %v1087_v37 = vmul.f32 %v1085_v36, %v1081_v35 }
 0xb5f   : > { %1089 = vrot.lane.b32.xlu0 %v1087_v37, %s1491_s30 }
 0xbd1   : > { %v1090_v38 = vpop.permute.xlu0 %1089 }
 0xbd2   : > { %v1092_v39 = vadd.f32 %v1090_v38, %v1002_v13 }
 0xbd4   : > { %1462 = vtanh.f32 %v1092_v39 }
 0xbde   : > { %v1463_v17 = vpop.eup %1462 }
 0xbdf   : > { %v1094_v40 = vsub.f32 %v923_v27, %v1463_v17 }
 0xbe1   : > { %1096 = vrot.lane.b32.xlu1 %v1094_v40, %s1493_s19 }
 0xc53   : > { %v1097_v41 = vpop.permute.xlu1 %1096 }
 0xc54   : > { %v1099_v21 = vmul.f32 %v1097_v41, %v1081_v35 }
 0xc56   : > { %1101 = vrot.lane.b32.xlu0 %v1099_v21, %s1492_s18 }
 0xcc8   : > { %v1102_v42 = vpop.permute.xlu0 %1101 }
 0xcc9   : > { %v1104_v43 = vadd.f32 %v1463_v17, %v1102_v42 }
 0xccb   : > { %1106 = vrot.lane.b32.xlu1 %v1104_v43, %s1491_s30 }
 0xd3d   : > { %v1107_v44 = vpop.permute.xlu1 %1106 }
 0xd3e   : > { %1274 = vst.msk [vmem:[%s1560_s12 + $0x18] sm:$0xff] %vm449_vm3, %v1107_v44  ;;  %1111 = vst.msk [vmem:[%s1715_s7] sm:$0xff] %vm449_vm3, %v1107_v44 }
 0xd3f PF: > { %s18_s26 = sadd.s32 1, %s1486_s26   ;;  %s1716_s24 = smov %s1482_s25 }
 0xd40   : > { %p15_p6 = scmp.ge.s32.totalorder %s18_s26, 6   ;;  %s1717_s25 = smov %s1719_s27 }
 0xd42   :  { %17 = sbr.rel (!%p15_p6) target bundleno = 2 (0x2), region = 102 }

</bundles_post_ra>
